<compile_context>
chip_gen: v6e
topology: v6e:2x2x1
jax: 0.10.0
libtpu: 0.0.40
codegen_flags: <defaults>
</compile_context>

<pallas_src>
import functools

import jax
import jax.numpy as jnp
from jax.experimental import pallas as pl
from jax.experimental.pallas import tpu as pltpu

BN_EPS = 1e-5


def _round_up(x, m):
    return ((x + m - 1) // m) * m


def _default_vmem_limit_bytes():
    """Per-chip VMEM budget: big tiles on v5e/v6e (128 MiB), safe on v7x (64 MiB)."""
    try:
        cap = int(pltpu.get_tpu_info().vmem_capacity_bytes)
    except Exception:
        cap = 64 * 1024 * 1024
    return max(32 * 1024 * 1024, min((cap * 3) // 4, 112 * 1024 * 1024))


def upconv_kernel(x_ref, w_ref, g_ref, b_ref, o_ref, xcol_ref, *,
                  B, C_in, C_in_r, K, mp, pad):
    """One C_out block: upsample + pad + im2col + conv + BN(train) + ReLU.

    x_ref:    (B*C_in, L)        input, channels-first rows, length on lanes
    w_ref:    (C_T, K*C_in_r)    im2col conv weights for this C_out block
    g_ref:    (C_T, 1)           BN gamma block
    b_ref:    (C_T, 1)           BN beta block
    o_ref:    (B, C_T, L_up)     output block (lane-dense: L_up last)
    xcol_ref: (K*C_in_r, B*L_up) VMEM scratch for the im2col stack
    """
    L = x_ref.shape[1]
    L_up = o_ref.shape[2]
    L_padded = L_up + 2 * pad
    cdtype = x_ref.dtype

    # --- 1) Nearest-neighbour upsample + zero pad as a one-hot matmul --------
    # U[j, p] = 1 iff padded upsampled position p maps back to source pos j,
    # i.e. j*mp <= (p - pad) < (j+1)*mp; pad positions match no source row and
    # come out exactly zero.  Small-L path (see TODO at top for large L).
    p_idx = jax.lax.broadcasted_iota(jnp.int32, (L, L_padded), 1)
    j_idx = jax.lax.broadcasted_iota(jnp.int32, (L, L_padded), 0)
    rel = p_idx - pad
    U = jnp.where((rel >= j_idx * mp) & (rel < (j_idx + 1) * mp), 1.0, 0.0)
    U = U.astype(cdtype)
    # (B*C_in, L) @ (L, L_padded): every batch row upsampled in one MXU push.
    xup = jnp.dot(x_ref[...], U, preferred_element_type=jnp.float32)
    xup = xup.astype(cdtype)   # exact: one-hot selection of cdtype values

    # --- 2) im2col staging: xcol[t*C_in_r + ci, b*L_up + m] = xup_pad[b,ci,m+t]
    # Tap row blocks are 8-sublane aligned; the padding rows are zeroed so the
    # zero-padded weights contract to exactly 0.
    # NOTE: xcol does not depend on the C_out grid index; it is rebuilt each
    # grid step because VMEM scratch is uninitialized (no reliable
    # "built-once-per-core" flag under the megacore grid split).  With the
    # small contraction sizes here the rebuild is cheap vs. the HBM writeback.
    n_cols = xcol_ref.shape[1]
    for t in range(K):
        r0 = t * C_in_r
        for b in range(B):
            xcol_ref[r0:r0 + C_in, b * L_up:(b + 1) * L_up] = (
                xup[b * C_in:(b + 1) * C_in, t:t + L_up])
        if C_in_r > C_in:
            xcol_ref[r0 + C_in:r0 + C_in_r, :] = jnp.zeros(
                (C_in_r - C_in, n_cols), cdtype)

    # --- 3) Conv1d as ONE wide matmul: (C_T, K*C_in_r) @ (K*C_in_r, B*L_up) --
    y = jnp.dot(w_ref[...], xcol_ref[...], preferred_element_type=jnp.float32)

    # --- 4) BatchNorm1d (training-mode batch stats) + ReLU --------------------
    # Two-pass centered variance (no E[x^2] - E[x]^2 cancellation), all in f32.
    inv_n = 1.0 / float(B * L_up)
    mean = jnp.sum(y, axis=1, keepdims=True) * inv_n           # (C_T, 1)
    yc = y - mean
    var = jnp.sum(yc * yc, axis=1, keepdims=True) * inv_n      # biased variance
    scale = g_ref[...] * jax.lax.rsqrt(var + BN_EPS)           # (C_T, 1)
    beta = b_ref[...]                                          # (C_T, 1)
    for b in range(B):
        o_ref[b] = jnp.maximum(
            yc[:, b * L_up:(b + 1) * L_up] * scale + beta, 0.0)


@functools.partial(jax.jit,
                   static_argnames=("kernel_size", "mp_factor", "compute_dtype"))
def upconv_block(x_ncl, weight_oik, gamma, beta, *, kernel_size, mp_factor,
                 compute_dtype="float32"):
    """x_ncl: (B, C_in, L); weight_oik: (C_out, C_in, K).  PyTorch layouts in & out."""
    B, C_in, L = x_ncl.shape
    C_out = weight_oik.shape[0]
    K = kernel_size
    assert K % 2 == 1, "padding=K//2 preserves length only for odd kernel_size"
    pad = K // 2
    L_up = L * mp_factor
    cdtype = jnp.dtype(compute_dtype)

    # Sublane-aligned per-tap channel stride (extra rows are zero).
    C_in_r = _round_up(C_in, 8)

    # Bounded C_out tile + wrapper-side channel padding: uniform block shapes,
    # pipelined grid, and >= 2 grid steps (v7x dual-TC) once C_out >= 2*C_T.
    if C_out >= 512 and C_out % 256 == 0:
        C_T = 256
    elif C_out >= 128:
        C_T = 128
    else:
        C_T = _round_up(C_out, 8)
    C_pad = _round_up(C_out, C_T)
    n_blocks = C_pad // C_T

    # Parameter-side prep (tiny): im2col weights (C_pad, K*C_in_r) with flat
    # index t*C_in_r + ci, matching the in-kernel tap stacking.  Padded output
    # channels get zero weights / gamma=1 / beta=0 -> exact zeros, sliced off.
    w = jnp.zeros((C_pad, K, C_in_r), jnp.float32)
    w = w.at[:C_out, :, :C_in].set(
        jnp.transpose(weight_oik.astype(jnp.float32), (0, 2, 1)))
    w_flat = w.reshape(C_pad, K * C_in_r).astype(cdtype)
    gamma_p = jnp.ones((C_pad, 1), jnp.float32).at[:C_out, 0].set(
        gamma.astype(jnp.float32))
    beta_p = jnp.zeros((C_pad, 1), jnp.float32).at[:C_out, 0].set(
        beta.astype(jnp.float32))

    # Activation stays in its native NCL layout; (B, C_in, L) -> (B*C_in, L)
    # is a free contiguous reshape (no transpose; x read from HBM once).
    x2d = x_ncl.reshape(B * C_in, L).astype(cdtype)

    kernel = functools.partial(upconv_kernel, B=B, C_in=C_in, C_in_r=C_in_r,
                               K=K, mp=mp_factor, pad=pad)

    out = pl.pallas_call(
        kernel,
        out_shape=jax.ShapeDtypeStruct((B, C_pad, L_up), jnp.float32),
        grid_spec=pltpu.PrefetchScalarGridSpec(
            num_scalar_prefetch=0,
            grid=(n_blocks,),
            in_specs=[
                # Resident activation (constant index map across the grid).
                pl.BlockSpec((B * C_in, L), lambda co: (0, 0)),
                pl.BlockSpec((C_T, K * C_in_r), lambda co: (co, 0)),
                pl.BlockSpec((C_T, 1), lambda co: (co, 0)),
                pl.BlockSpec((C_T, 1), lambda co: (co, 0)),
            ],
            out_specs=pl.BlockSpec((B, C_T, L_up), lambda co: (0, co, 0)),
            scratch_shapes=[pltpu.VMEM((K * C_in_r, B * L_up), cdtype)],
        ),
        compiler_params=pltpu.CompilerParams(
            dimension_semantics=("parallel",),   # BN stats are per-channel
            vmem_limit_bytes=_default_vmem_limit_bytes(),
        ),
    )(x2d, w_flat, gamma_p, beta_p)

    if C_pad != C_out:
        out = out[:, :C_out, :]
    return out   # (B, C_out, L_up), PyTorch NCL layout, no transpose


def reference_upconv_block(x_ncl, weight_oik, gamma, beta, *, kernel_size, mp_factor):
    """Pure-JAX reference matching PyTorch training-mode forward semantics."""
    pad = kernel_size // 2
    x_up = jnp.repeat(x_ncl.astype(jnp.float32), mp_factor, axis=2)
    y = jax.lax.conv_general_dilated(
        x_up, weight_oik.astype(jnp.float32),
        window_strides=(1,), padding=[(pad, pad)],
        dimension_numbers=("NCH", "OIH", "NCH"))
    mean = jnp.mean(y, axis=(0, 2), keepdims=True)
    var = jnp.mean((y - mean) ** 2, axis=(0, 2), keepdims=True)
    yhat = (y - mean) * jax.lax.rsqrt(var + BN_EPS)
    yhat = yhat * gamma.reshape(1, -1, 1) + beta.reshape(1, -1, 1)
    return jnp.maximum(yhat, 0.0)


def _run_case(key, *, B, C_in, L, C_out, K, mp, compute_dtype, atol, rtol, name):
    kx, kw, kg, kb = jax.random.split(key, 4)
    x = jax.random.normal(kx, (B, C_in, L), dtype=jnp.float32)
    w = 0.1 * jax.random.normal(kw, (C_out, C_in, K), dtype=jnp.float32)
    g = 1.0 + 0.1 * jax.random.normal(kg, (C_out,), dtype=jnp.float32)
    b = 0.1 * jax.random.normal(kb, (C_out,), dtype=jnp.float32)

    out = upconv_block(x, w, g, b, kernel_size=K, mp_factor=mp,
                       compute_dtype=compute_dtype)
    out = jax.block_until_ready(out)
    ref = reference_upconv_block(x, w, g, b, kernel_size=K, mp_factor=mp)

    assert out.shape == (B, C_out, L * mp), (name, out.shape)
    err = float(jnp.max(jnp.abs(out - ref)))
    assert jnp.allclose(out, ref, atol=atol, rtol=rtol), (name, err)


if __name__ == "__main__":
    key = jax.random.PRNGKey(0)
    k1, k2, k3 = jax.random.split(key, 3)

    # Small shapes consistent with the module (Conv1d input is (B, C_in, L)).
    _run_case(k1, B=2, C_in=4, L=16, C_out=8, K=3, mp=2,
              compute_dtype="float32", atol=2e-4, rtol=2e-4, name="f32-small")
    # Multi-block C_out grid (C_T=128 -> 2 pipelined/parallel steps), larger K.
    _run_case(k2, B=2, C_in=8, L=16, C_out=256, K=5, mp=2,
              compute_dtype="float32", atol=2e-4, rtol=2e-4, name="f32-grid2")
    # bf16 MXU inputs, f32 accumulation / BN / output (looser tolerance).
    _run_case(k3, B=2, C_in=4, L=16, C_out=8, K=3, mp=2,
              compute_dtype="bfloat16", atol=5e-2, rtol=5e-2, name="bf16-small")

    print("KERNEL_OK")
</pallas_src>

<mosaic_0001>
module attributes {stable_mosaic.version = 11 : i64} {
  func.func @upconv_kernel(%arg0: i32, %arg1: memref<8x16xf32, #tpu.memory_space<vmem>>, %arg2: memref<8x24xf32, #tpu.memory_space<vmem>>, %arg3: memref<8x1xf32, #tpu.memory_space<vmem>>, %arg4: memref<8x1xf32, #tpu.memory_space<vmem>>, %arg5: memref<2x8x32xf32, #tpu.memory_space<vmem>>, %arg6: memref<24x64xf32, #tpu.memory_space<vmem>>) attributes {dimension_semantics = [#tpu.dimension_semantics<parallel>], iteration_bounds = array<i64: 1>, scalar_prefetch = 0 : i64, scratch_operands = 1 : i64, tpu.core_type = #tpu.core_type<tc>, window_params = [{pipeline_mode = #tpu.pipeline_mode<synchronous>, transform_indices = @transform_0, window_bounds = array<i64: 8, 16>}, {transform_indices = @transform_1, window_bounds = array<i64: 8, 24>}, {transform_indices = @transform_2, window_bounds = array<i64: 8, 1>}, {transform_indices = @transform_3, window_bounds = array<i64: 8, 1>}, {transform_indices = @transform_4, window_bounds = array<i64: 2, 8, 32>}]} {
    %0 = tpu.iota {dimensions = array<i32: 1>} : vector<16x34xi32>
    %1 = tpu.iota {dimensions = array<i32: 0>} : vector<16x34xi32>
    %c1_i32 = arith.constant 1 : i32
    %2 = vector.broadcast %c1_i32 : i32 to vector<16x34xi32>
    %3 = arith.subi %0, %2 : vector<16x34xi32>
    %c2_i32 = arith.constant 2 : i32
    %4 = vector.broadcast %c2_i32 : i32 to vector<16x34xi32>
    %5 = arith.muli %1, %4 : vector<16x34xi32>
    %6 = arith.cmpi sge, %3, %5 : vector<16x34xi32>
    %c1_i32_0 = arith.constant 1 : i32
    %7 = vector.broadcast %c1_i32_0 : i32 to vector<16x34xi32>
    %8 = arith.addi %1, %7 : vector<16x34xi32>
    %c2_i32_1 = arith.constant 2 : i32
    %9 = vector.broadcast %c2_i32_1 : i32 to vector<16x34xi32>
    %10 = arith.muli %8, %9 : vector<16x34xi32>
    %11 = arith.cmpi slt, %3, %10 : vector<16x34xi32>
    %12 = arith.andi %6, %11 : vector<16x34xi1>
    %cst = arith.constant 1.000000e+00 : f32
    %cst_2 = arith.constant 0.000000e+00 : f32
    %13 = vector.broadcast %cst : f32 to vector<16x34xf32>
    %14 = vector.broadcast %cst_2 : f32 to vector<16x34xf32>
    %15 = arith.select %12, %13, %14 : vector<16x34xi1>, vector<16x34xf32>
    %c0 = arith.constant 0 : index
    %c0_3 = arith.constant 0 : index
    %16 = vector.load %arg1[%c0, %c0_3] : memref<8x16xf32, #tpu.memory_space<vmem>>, vector<8x16xf32>
    %cst_4 = arith.constant dense<0.000000e+00> : vector<8x34xf32>
    %17 = tpu.matmul %16, %15, %cst_4 {dimension_numbers = #tpu.dot_dimension_numbers<[1], [0], [0], [1], [0, 0, 1, 1], [], []>} : vector<8x16xf32>, vector<16x34xf32>, vector<8x34xf32> -> vector<8x34xf32>
    %18 = vector.extract_strided_slice %17 {offsets = [0, 0], sizes = [4, 32], strides = [1, 1]} : vector<8x34xf32> to vector<4x32xf32>
    %c0_5 = arith.constant 0 : index
    %c0_6 = arith.constant 0 : index
    %19 = vector.load %arg6[%c0_5, %c0_6] : memref<24x64xf32, #tpu.memory_space<vmem>>, vector<4x32xf32>
    tpu.vector_store %arg6[%c0_5, %c0_6], %18 {strides = array<i32>} : memref<24x64xf32, #tpu.memory_space<vmem>>, vector<4x32xf32>,
    %20 = vector.extract_strided_slice %17 {offsets = [4, 0], sizes = [4, 32], strides = [1, 1]} : vector<8x34xf32> to vector<4x32xf32>
    %c0_7 = arith.constant 0 : index
    %c32 = arith.constant 32 : index
    %21 = vector.load %arg6[%c0_7, %c32] : memref<24x64xf32, #tpu.memory_space<vmem>>, vector<4x32xf32>
    tpu.vector_store %arg6[%c0_7, %c32], %20 {strides = array<i32>} : memref<24x64xf32, #tpu.memory_space<vmem>>, vector<4x32xf32>,
    %cst_8 = arith.constant 0.000000e+00 : f32
    %22 = vector.broadcast %cst_8 : f32 to vector<4x64xf32>
    %c4 = arith.constant 4 : index
    %c0_9 = arith.constant 0 : index
    %23 = vector.load %arg6[%c4, %c0_9] : memref<24x64xf32, #tpu.memory_space<vmem>>, vector<4x64xf32>
    tpu.vector_store %arg6[%c4, %c0_9], %22 {strides = array<i32>} : memref<24x64xf32, #tpu.memory_space<vmem>>, vector<4x64xf32>,
    %24 = vector.extract_strided_slice %17 {offsets = [0, 1], sizes = [4, 32], strides = [1, 1]} : vector<8x34xf32> to vector<4x32xf32>
    %c8 = arith.constant 8 : index
    %c0_10 = arith.constant 0 : index
    %25 = vector.load %arg6[%c8, %c0_10] : memref<24x64xf32, #tpu.memory_space<vmem>>, vector<4x32xf32>
    tpu.vector_store %arg6[%c8, %c0_10], %24 {strides = array<i32>} : memref<24x64xf32, #tpu.memory_space<vmem>>, vector<4x32xf32>,
    %26 = vector.extract_strided_slice %17 {offsets = [4, 1], sizes = [4, 32], strides = [1, 1]} : vector<8x34xf32> to vector<4x32xf32>
    %c8_11 = arith.constant 8 : index
    %c32_12 = arith.constant 32 : index
    %27 = vector.load %arg6[%c8_11, %c32_12] : memref<24x64xf32, #tpu.memory_space<vmem>>, vector<4x32xf32>
    tpu.vector_store %arg6[%c8_11, %c32_12], %26 {strides = array<i32>} : memref<24x64xf32, #tpu.memory_space<vmem>>, vector<4x32xf32>,
    %cst_13 = arith.constant 0.000000e+00 : f32
    %28 = vector.broadcast %cst_13 : f32 to vector<4x64xf32>
    %c12 = arith.constant 12 : index
    %c0_14 = arith.constant 0 : index
    %29 = vector.load %arg6[%c12, %c0_14] : memref<24x64xf32, #tpu.memory_space<vmem>>, vector<4x64xf32>
    tpu.vector_store %arg6[%c12, %c0_14], %28 {strides = array<i32>} : memref<24x64xf32, #tpu.memory_space<vmem>>, vector<4x64xf32>,
    %30 = vector.extract_strided_slice %17 {offsets = [0, 2], sizes = [4, 32], strides = [1, 1]} : vector<8x34xf32> to vector<4x32xf32>
    %c16 = arith.constant 16 : index
    %c0_15 = arith.constant 0 : index
    %31 = vector.load %arg6[%c16, %c0_15] : memref<24x64xf32, #tpu.memory_space<vmem>>, vector<4x32xf32>
    tpu.vector_store %arg6[%c16, %c0_15], %30 {strides = array<i32>} : memref<24x64xf32, #tpu.memory_space<vmem>>, vector<4x32xf32>,
    %32 = vector.extract_strided_slice %17 {offsets = [4, 2], sizes = [4, 32], strides = [1, 1]} : vector<8x34xf32> to vector<4x32xf32>
    %c16_16 = arith.constant 16 : index
    %c32_17 = arith.constant 32 : index
    %33 = vector.load %arg6[%c16_16, %c32_17] : memref<24x64xf32, #tpu.memory_space<vmem>>, vector<4x32xf32>
    tpu.vector_store %arg6[%c16_16, %c32_17], %32 {strides = array<i32>} : memref<24x64xf32, #tpu.memory_space<vmem>>, vector<4x32xf32>,
    %cst_18 = arith.constant 0.000000e+00 : f32
    %34 = vector.broadcast %cst_18 : f32 to vector<4x64xf32>
    %c20 = arith.constant 20 : index
    %c0_19 = arith.constant 0 : index
    %35 = vector.load %arg6[%c20, %c0_19] : memref<24x64xf32, #tpu.memory_space<vmem>>, vector<4x64xf32>
    tpu.vector_store %arg6[%c20, %c0_19], %34 {strides = array<i32>} : memref<24x64xf32, #tpu.memory_space<vmem>>, vector<4x64xf32>,
    %c0_20 = arith.constant 0 : index
    %c0_21 = arith.constant 0 : index
    %36 = vector.load %arg2[%c0_20, %c0_21] : memref<8x24xf32, #tpu.memory_space<vmem>>, vector<8x24xf32>
    %c0_22 = arith.constant 0 : index
    %c0_23 = arith.constant 0 : index
    %37 = vector.load %arg6[%c0_22, %c0_23] : memref<24x64xf32, #tpu.memory_space<vmem>>, vector<24x64xf32>
    %cst_24 = arith.constant dense<0.000000e+00> : vector<8x64xf32>
    %38 = tpu.matmul %36, %37, %cst_24 {dimension_numbers = #tpu.dot_dimension_numbers<[1], [0], [0], [1], [0, 0, 1, 1], [], []>} : vector<8x24xf32>, vector<24x64xf32>, vector<8x64xf32> -> vector<8x64xf32>
    %cst_25 = arith.constant dense<0.000000e+00> : vector<8xf32>
    %39 = vector.multi_reduction <add>, %38, %cst_25 [1] : vector<8x64xf32> to vector<8xf32>
    %40 = vector.shape_cast %39 : vector<8xf32> to vector<8x1xf32>
    %cst_26 = arith.constant 1.562500e-02 : f32
    %41 = vector.broadcast %cst_26 : f32 to vector<8x1xf32>
    %42 = arith.mulf %40, %41 : vector<8x1xf32>
    %43 = vector.broadcast %42 : vector<8x1xf32> to vector<8x64xf32>
    %44 = arith.subf %38, %43 : vector<8x64xf32>
    %45 = arith.mulf %44, %44 : vector<8x64xf32>
    %cst_27 = arith.constant dense<0.000000e+00> : vector<8xf32>
    %46 = vector.multi_reduction <add>, %45, %cst_27 [1] : vector<8x64xf32> to vector<8xf32>
    %47 = vector.shape_cast %46 : vector<8xf32> to vector<8x1xf32>
    %cst_28 = arith.constant 1.562500e-02 : f32
    %48 = vector.broadcast %cst_28 : f32 to vector<8x1xf32>
    %49 = arith.mulf %47, %48 : vector<8x1xf32>
    %c0_29 = arith.constant 0 : index
    %c0_30 = arith.constant 0 : index
    %50 = vector.load %arg3[%c0_29, %c0_30] : memref<8x1xf32, #tpu.memory_space<vmem>>, vector<8x1xf32>
    %cst_31 = arith.constant 9.99999974E-6 : f32
    %51 = vector.broadcast %cst_31 : f32 to vector<8x1xf32>
    %52 = arith.addf %49, %51 : vector<8x1xf32>
    %53 = math.rsqrt %52 : vector<8x1xf32>
    %54 = arith.mulf %50, %53 : vector<8x1xf32>
    %c0_32 = arith.constant 0 : index
    %c0_33 = arith.constant 0 : index
    %55 = vector.load %arg4[%c0_32, %c0_33] : memref<8x1xf32, #tpu.memory_space<vmem>>, vector<8x1xf32>
    %56 = vector.extract_strided_slice %44 {offsets = [0, 0], sizes = [8, 32], strides = [1, 1]} : vector<8x64xf32> to vector<8x32xf32>
    %57 = vector.broadcast %54 : vector<8x1xf32> to vector<8x32xf32>
    %58 = arith.mulf %56, %57 : vector<8x32xf32>
    %59 = vector.broadcast %55 : vector<8x1xf32> to vector<8x32xf32>
    %60 = arith.addf %58, %59 : vector<8x32xf32>
    %cst_34 = arith.constant 0.000000e+00 : f32
    %61 = vector.broadcast %cst_34 : f32 to vector<8x32xf32>
    %62 = arith.maximumf %60, %61 : vector<8x32xf32>
    %c0_35 = arith.constant 0 : index
    %c0_36 = arith.constant 0 : index
    %c0_37 = arith.constant 0 : index
    %63 = vector.load %arg5[%c0_35, %c0_36, %c0_37] : memref<2x8x32xf32, #tpu.memory_space<vmem>>, vector<1x8x32xf32>
    %64 = vector.shape_cast %63 : vector<1x8x32xf32> to vector<8x32xf32>
    %65 = vector.shape_cast %62 : vector<8x32xf32> to vector<1x8x32xf32>
    tpu.vector_store %arg5[%c0_35, %c0_36, %c0_37], %65 {strides = array<i32>} : memref<2x8x32xf32, #tpu.memory_space<vmem>>, vector<1x8x32xf32>,
    %66 = vector.extract_strided_slice %44 {offsets = [0, 32], sizes = [8, 32], strides = [1, 1]} : vector<8x64xf32> to vector<8x32xf32>
    %67 = vector.broadcast %54 : vector<8x1xf32> to vector<8x32xf32>
    %68 = arith.mulf %66, %67 : vector<8x32xf32>
    %69 = vector.broadcast %55 : vector<8x1xf32> to vector<8x32xf32>
    %70 = arith.addf %68, %69 : vector<8x32xf32>
    %cst_38 = arith.constant 0.000000e+00 : f32
    %71 = vector.broadcast %cst_38 : f32 to vector<8x32xf32>
    %72 = arith.maximumf %70, %71 : vector<8x32xf32>
    %c1 = arith.constant 1 : index
    %c0_39 = arith.constant 0 : index
    %c0_40 = arith.constant 0 : index
    %73 = vector.load %arg5[%c1, %c0_39, %c0_40] : memref<2x8x32xf32, #tpu.memory_space<vmem>>, vector<1x8x32xf32>
    %74 = vector.shape_cast %73 : vector<1x8x32xf32> to vector<8x32xf32>
    %75 = vector.shape_cast %72 : vector<8x32xf32> to vector<1x8x32xf32>
    tpu.vector_store %arg5[%c1, %c0_39, %c0_40], %75 {strides = array<i32>} : memref<2x8x32xf32, #tpu.memory_space<vmem>>, vector<1x8x32xf32>,
    return
  }
  func.func @transform_0(%arg0: i32) -> (i32, i32) {
    %c0_i32 = arith.constant 0 : i32
    %c0_i32_0 = arith.constant 0 : i32
    %c0_i32_1 = arith.constant 0 : i32
    return %c0_i32, %c0_i32_0 : i32, i32
  }
  func.func @transform_1(%arg0: i32) -> (i32, i32) {
    %c0_i32 = arith.constant 0 : i32
    %c0_i32_0 = arith.constant 0 : i32
    return %arg0, %c0_i32 : i32, i32
  }
  func.func @transform_2(%arg0: i32) -> (i32, i32) {
    %c0_i32 = arith.constant 0 : i32
    %c0_i32_0 = arith.constant 0 : i32
    return %arg0, %c0_i32 : i32, i32
  }
  func.func @transform_3(%arg0: i32) -> (i32, i32) {
    %c0_i32 = arith.constant 0 : i32
    %c0_i32_0 = arith.constant 0 : i32
    return %arg0, %c0_i32 : i32, i32
  }
  func.func @transform_4(%arg0: i32) -> (i32, i32, i32) {
    %c0_i32 = arith.constant 0 : i32
    %c0_i32_0 = arith.constant 0 : i32
    %c0_i32_1 = arith.constant 0 : i32
    return %c0_i32, %arg0, %c0_i32_0 : i32, i32, i32
  }
}

</mosaic_0001>

<bundles_post_ra>
// kernel: upconv_block.1
= control target key start
LH: loop header
LB: loop body
LE: loop exit
PB: predicated region body
PF: predicated region fallthrough
CT: control target
= control target key end

     0   :  { %v18_v0 = vlaneseq  ;;  %s405_s0 = inlined_call_operand.vmem [shape: f32[8,16], index: 0, kind: input, shape index: {}]   ;;  %s406_s1 = inlined_call_operand.vmem [shape: f32[8,24], index: 1, kind: input, shape index: {}]   ;;  %s407_s2 = inlined_call_operand.vmem [shape: f32[8,1], index: 2, kind: input, shape index: {}]   ;;  %s408_s3 = inlined_call_operand.vmem [shape: f32[8,1], index: 3, kind: input, shape index: {}]   ;;  %s409_s4 = inlined_call_operand.hbm [shape: f32[2,8,32], index: 4, kind: output, shape index: {}]  }
   0x1   :  { %9 = vsyncpa [#allocation4], 0  ;;  %v339_v1 = vmov 0.0   ;;  %vm340_vm0 = vmmov 0   ;;  %v341_v12 = vmov 1.0   ;;  %v38_v13 = vld [vmem:[%s405_s0] sm:$0xff] }
   0x2   :  { %284 = vmatprep.subr.mxu0 %v339_v1  ;;  %288 = vmatprep.mubr.msk.f32.mxu0 %vm340_vm0, %v339_v1  ;;  %v19_v2 = vand.u32 127, %v18_v0  ;;  %v21_v3 = vshrl.u32 %v18_v0, 7  ;;  %vm39_vm7 = vcmask 130048   ;;  %vm121_vm8 = vcmask 519168   ;;  %s342_s17 = smov 127   ;;  %s343_s18 = smov 126  }
   0x3   :  { %291 = vmatprep.subr.mxu1 %v339_v1  ;;  %297 = vmatprep.mubr.msk.f32.mxu1 %vm340_vm0, %v339_v1  ;;  %140 = vst.msk [vmem:[#allocation2 + $0x14] sm:$0xf] %vm121_vm8, %v339_v1  ;;  %122 = vst.msk [vmem:[#allocation2 + $0x4] sm:$0xf] %vm121_vm8, %v339_v1  ;;  %vm113_vm9 = vcmask 257024   ;;  %s344_s0 = smov 31  }
   0x4   :  { %v22_v4 = vadd.s32 8, %v21_v3  ;;  %v272_v5 = vadd.s32 4294967295, %v19_v2  ;;  %v24_v6 = vmul.u32 2, %v21_v3  ;;  %v28_v7 = vadd.s32 1, %v21_v3  ;;  %131 = vst.msk [vmem:[#allocation2 + $0xc] sm:$0xf] %vm121_vm8, %v339_v1 }
   0x5   :  { %s345_s19 = smov 30   ;;  %s346_s20 = smov 32   ;;  %vm119_vm10 = vcmask 523524   ;;  %v141_v23 = vld [vmem:[%s406_s1] sm:$0xff]  ;;  %vm145_vm11 = vcmask 195584   ;;  %vm219_vm12 = vcmask 523264  }
   0x6   :  { %v25_v8 = vmul.u32 2, %v22_v4  ;;  %v29_v9 = vadd.s32 1, %v22_v4  ;;  %v30_v10 = vmul.u32 2, %v28_v7  ;;  %vm26_vm1 = vcmp.ge.s32.totalorder %v272_v5, %v24_v6  ;;  %v234_v34 = vld [vmem:[%s408_s3] sm:$0xff]  ;;  %s348_s26 = smov 96   ;;  %s349_s3 = smov [#allocation3]  }
   0x7   :  { %v347_v33 = vmov 0   ;;  %v230_v38 = vld [vmem:[%s407_s2] sm:$0xff]  ;;  %vm248_vm13 = vcmask 261120   ;;  %s261_s27 = sshll.u32 %s349_s3, 4  ;;  %s262_s27 = int_to_ptr.vmem [resolvable:$true] %s261_s27 }
   0x8   :  { %vm27_vm2 = vcmp.ge.s32.totalorder %v272_v5, %v25_v8  ;;  %v31_v11 = vmul.u32 2, %v29_v9  ;;  %vm32_vm3 = vcmp.lt.s32.totalorder %v272_v5, %v30_v10  ;;  %313 = vset.pattern.permute.xlu0 %v347_v33  ;;  %314 = vset.pattern.permute.xlu1 %v347_v33  ;;  %s317_s28 = scalar_lea.vmem %s262_s27, 256  ;;  %p322_p1 = scmp.lt.s32.totalorder %s262_s27, %s262_s27 }
   0x9   :  { %vm34_vm5 = vmand %vm26_vm1, %vm32_vm3  ;;  %p318_p0 = scmp.ne.s32.totalorder %s262_s27, %s317_s28  ;;  %p323_p2 = scmp.lt.s32.totalorder %s317_s28, %s317_s28 }
   0xa   :  { %vm33_vm4 = vcmp.lt.s32.totalorder %v272_v5, %v31_v11 }
   0xb   :  { %vm35_vm6 = vmand %vm27_vm2, %vm33_vm4  ;;  %p324_p3 = por %p323_p2, %p322_p1 }
   0xc   :  { %285 = vmatpush3.msk.msra.mxu0 %vm35_vm6, %v341_v12 }
   0xd   :  { %286 = vmatprep.subr.mxu0 %v339_v1  ;;  %p325_p4 = pnand %p324_p3, %p318_p0 }
   0xe   :  { %287 = vmatpush3.msk.msra.mxu0 %vm34_vm5, %v341_v12 }
   0xf   :  { %289 = vmatmul.mubr.msk.f32.vlgmr.msra.gmra.mxu0 %vm39_vm7, %v38_v13 }
  0xcf   :  { %v109_v14 = vpop.f32.mrf.mxu0 }
  0xd0   :  { %123 = vrot.lane.b32.xlu1 %v109_v14, %s342_s17  ;;  %132 = vrot.lane.b32.xlu0 %v109_v14, %s343_s18  ;;  %114 = vst.msk [vmem:[#allocation2] sm:$0xf] %vm113_vm9, %v109_v14 }
  0xd1   :  { %v290_v15 = vpop.f32.mrf.mxu0 }
  0xd4   :  { %127 = vrot.lane.b32.xlu1 %v109_v14, %s344_s0  ;;  %136 = vrot.lane.b32.xlu0 %v109_v14, %s345_s19 }
  0xd8   :  { %116 = vrot.lane.b32.xlu0 %v109_v14, %s346_s20 }
 0x142   :  { %v124_v16 = vpop.permute.xlu1 %123  ;;  %v133_v17 = vpop.permute.xlu0 %132 }
 0x143   :  { %126 = vst.msk [vmem:[#allocation2 + $0x8] sm:$0xf] %vm113_vm9, %v124_v16  ;;  %135 = vst.msk [vmem:[#allocation2 + $0x10] sm:$0xf] %vm113_vm9, %v133_v17 }
 0x146   :  { %v128_v18 = vpop.permute.xlu1 %127  ;;  %v137_v19 = vpop.permute.xlu0 %136 }
 0x147   :  { %130 = vst.msk [vmem:[#allocation2 + $0x4] sm:$0xf0] %vm119_vm10, %v128_v18  ;;  %139 = vst.msk [vmem:[#allocation2 + $0xc] sm:$0xf0] %vm119_vm10, %v137_v19 }
 0x14a   :  { %v117_v20 = vpop.permute.xlu0 %116 }
 0x14b   :  { %120 = vst.msk [vmem:[#allocation2 - $0x4] sm:$0xf0] %vm119_vm10, %v117_v20 }
 0x14e   :  { %v144_v21 = vld [vmem:[#allocation2 + $0x10] sm:$0xff]  ;;  %v143_v22 = vld [vmem:[#allocation2 + $0x8] sm:$0xff] }
 0x14f   :  { %292 = vmatpush3.msra.mxu1 %v144_v21 }
 0x150   :  { %293 = vmatprep.subr.mxu1 %v339_v1 }
 0x151   :  { %294 = vmatpush3.msra.mxu1 %v143_v22 }
 0x152   :  { %295 = vmatprep.subr.mxu1 %v339_v1  ;;  %v142_v24 = vld [vmem:[#allocation2] sm:$0xff] }
 0x153   :  { %296 = vmatpush3.msra.mxu1 %v142_v24 }
 0x154   :  { %298 = vmatmul.mubr.msk.f32.vlgmr.msra.gmra.mxu1 %vm145_vm11, %v141_v23 }
 0x214   :  { %v215_v25 = vpop.f32.mrf.mxu1 }
 0x215   :  { %v220_v26 = vsel %vm219_vm12, %v215_v25, 0.0 }
 0x216   :  { %221 = vadd.xlane.f32.xlu1 %v220_v26  ;;  %v299_v27 = vpop.f32.mrf.mxu1 }
 0x227   :  { %243 = vperm.xlu1 %314, %v234_v34  }
 0x29f   :  { %v222_v28 = vpop.xlane.xlu1 %221 }
 0x2a0   :  { %v223_v29 = vmul.f32 0.015625, %v222_v28 }
 0x2a2   :  { %v224_v30 = vsub.f32 %v215_v25, %v223_v29 }
 0x2a3   :  { %v244_v42 = vpop.permute.xlu1 %243 }
 0x2a4   :  { %v225_v31 = vmul.f32 %v224_v30, %v224_v30 }
 0x2a6   :  { %v226_v32 = vsel %vm219_vm12, %v225_v31, 0.0 }
 0x2a7   :  { %227 = vadd.xlane.f32.xlu0 %v226_v32 }
 0x330   :  { %v228_v35 = vpop.xlane.xlu0 %227 }
 0x331   :  { %v229_v36 = vmul.f32 0.015625, %v228_v35 }
 0x333   :  { %v231_v37 = vadd.f32 1e-05, %v229_v36 }
 0x335   :  { %315 = vrsqrt.f32 %v231_v37 }
 0x342   :  { %v316_v39 = vpop.eup %315 }
 0x343   :  { %v233_v40 = vmul.f32 %v316_v39, %v230_v38 }
 0x345   :  { %237 = vperm.xlu0 %313, %v233_v40  }
 0x3c0   :  { %v238_v41 = vpop.permute.xlu0 %237 }
 0x3c1   :  { %v240_v43 = vmul.f32 %v238_v41, %v224_v30 }
 0x3c3   :  { %v246_v44 = vadd.f32 %v244_v42, %v240_v43 }
 0x3c5   :  { %v247_v45 = vmax.f32 %v246_v44, 0.0 }
 0x3c7   :  { %251 = vrot.lane.b32.xlu1 %v247_v45, %s348_s26  ;;  %249 = vst.msk [vmem:[#allocation3] sm:$0xff] %vm248_vm13, %v247_v45 }
 0x439   :  { %v252_v46 = vpop.permute.xlu1 %251 }
 0x43a   :  { %255 = vst.msk [vmem:[#allocation3 + $0x8] sm:$0xff] %vm248_vm13, %v252_v46 }
 0x43b   :  { %328 = shalt.err (!%p325_p4)
}
 0x43c   :  { %s350_s2 = smov 128   ;;  %s351_s29 = smov 8  }
 0x43d   :  { %267 = dma.vmem_to_hbm [thread:$0]  %s262_s27, 256, %s409_s4, [#allocation4], %s350_s2, %s350_s2, %s351_s29  }
 0x43e   :  { %337 = dma.done.wait [#allocation4], 256  }
 0x43f   :  { %338 = vsyncadd [#allocation4], 4294967040 }
 0x440   :  { %271 = vsyncpa [#allocation4], 1 }

</bundles_post_ra>
